<compile_context>
chip_gen: v7x
topology: tpu7x:2x2x1
jax: 0.10.0
libtpu: 0.0.40
codegen_flags: <defaults>
</compile_context>

<pallas_src>
import jax
import jax.numpy as jnp
from jax import lax
from jax.experimental import pallas as pl
from jax.experimental.pallas import tpu as pltpu

IN_DIM = 4                       # layers[0]
OUT_DIM = 5                      # layers[1] = 2 (loc) + 2 (log diag) + 1 (off-diag)
GAUSS_DIM = 2
LOC_COLS = GAUSS_DIM             # 2 values per batch:  [loc0, loc1]
TRIL_COLS = GAUSS_DIM * GAUSS_DIM  # 4 values per batch: [s00, s01(=0), s10, s11]
LANE = 128
SUBLANE = 8
B_GROUP = LANE // IN_DIM         # 32 batches per 128-lane row of the x slab
BATCH_ALIGN = B_GROUP * SUBLANE  # 256: keeps slab row counts sublane-aligned
DEFAULT_TILE_BATCH = 65536       # batches per grid step (~2.6 MB HBM / step)


def _procoder_kernel(x_ref, mloc_ref, mtril_ref, bloc_ref, btril_ref,
                     loc_ref, tril_ref):
    # x_ref    : (rows, 128)  native batch-major x: lane = 4*b_local + feature
    # mloc_ref : (128, 64)    kron(I_32, w[:, :2])             (interleave matmul)
    # mtril_ref: (128, 128)   kron(I_32, [w2 | 0 | w4 | w3])
    # bloc_ref : (1, 64)      lane-replicated [b0, b1]
    # btril_ref: (1, 128)     lane-replicated [b2, 0, b4, b3]
    # loc_ref  : (rows, 64)   lane = 2*b_local + c   (flat == (B, 2) row-major)
    # tril_ref : (rows, 128)  lane = 4*b_local + c   (flat == (B, 2, 2) row-major)
    x = x_ref[...].astype(jnp.float32)

    loc_ref[...] = (
        jnp.dot(x, mloc_ref[...], preferred_element_type=jnp.float32)
        + bloc_ref[...])

    pre = (jnp.dot(x, mtril_ref[...], preferred_element_type=jnp.float32)
           + btril_ref[...])
    col = lax.broadcasted_iota(jnp.int32, pre.shape, 1) & (TRIL_COLS - 1)
    diag = (col == 0) | (col == 3)            # scale_tril diagonal -> exp()
    tril_ref[...] = jnp.where(diag, jnp.exp(pre), pre)


def _interleave_tables(w, b):
    """Tiny constant tables (<100 KB) mapping the interleaved 128-lane x rows
    (32 batches x 4 features) straight to interleaved batch-major outputs."""
    w = w.astype(jnp.float32)
    b = b.astype(jnp.float32).reshape(-1)
    eye = jnp.eye(B_GROUP, dtype=jnp.float32)                       # (32, 32)
    zero_col = jnp.zeros((IN_DIM,), jnp.float32)
    w_loc = w[:, :GAUSS_DIM]                                        # (4, 2)
    w_tril = jnp.stack([w[:, 2], zero_col, w[:, 4], w[:, 3]], axis=1)  # (4, 4)
    m_loc = jnp.kron(eye, w_loc)                                    # (128, 64)
    m_tril = jnp.kron(eye, w_tril)                                  # (128, 128)
    b_loc = jnp.tile(b[:GAUSS_DIM], B_GROUP).reshape(1, B_GROUP * LOC_COLS)
    tril_pat = jnp.stack([b[2], jnp.zeros((), jnp.float32), b[4], b[3]])
    b_tril = jnp.tile(tril_pat, B_GROUP).reshape(1, B_GROUP * TRIL_COLS)
    return m_loc, m_tril, b_loc, b_tril


def procoder_forward(x, w, b, *, tile_batch=DEFAULT_TILE_BATCH):
    """x: (B, IN_DIM); w: (IN_DIM, OUT_DIM) pre-transposed nn.Linear weight; b: (OUT_DIM,).
    Returns (loc (B, 2) f32, scale_tril (B, 2, 2) f32)."""
    B = x.shape[0]
    m_loc, m_tril, b_loc, b_tril = _interleave_tables(w, b)

    # ---- tiling: pad B only to 256-batch alignment; derive the tile from B ----
    rows0 = (pl.cdiv(B, BATCH_ALIGN) * BATCH_ALIGN) // B_GROUP      # multiple of 8
    max_rows = max(SUBLANE, (tile_batch // B_GROUP) // SUBLANE * SUBLANE)
    n_steps = max(1, pl.cdiv(rows0, max_rows))
    if n_steps == 1 and rows0 >= 1024:      # >=32K batches: feed both v7x TCs
        n_steps = 2
    if n_steps > 1 and n_steps % 2:
        n_steps += 1                        # even step count for 2-TC balance
    rows_per_step = pl.cdiv(pl.cdiv(rows0, n_steps), SUBLANE) * SUBLANE
    rows = n_steps * rows_per_step
    Bp = rows * B_GROUP

    xf = x.reshape(-1)                      # contiguous view of native (B, 4) layout
    if Bp != B:
        xf = jnp.pad(xf, (0, (Bp - B) * IN_DIM))
    x_slab = xf.reshape(rows, LANE)         # lane-dense, batch-major interleaved

    loc_flat, tril_flat = pl.pallas_call(
        _procoder_kernel,
        out_shape=(
            jax.ShapeDtypeStruct((rows, B_GROUP * LOC_COLS), jnp.float32),
            jax.ShapeDtypeStruct((rows, B_GROUP * TRIL_COLS), jnp.float32),
        ),
        grid_spec=pltpu.PrefetchScalarGridSpec(
            num_scalar_prefetch=0,
            grid=(n_steps,),
            in_specs=[
                pl.BlockSpec((rows_per_step, LANE), lambda i: (i, 0)),           # x
                pl.BlockSpec((LANE, B_GROUP * LOC_COLS), lambda i: (0, 0)),      # m_loc
                pl.BlockSpec((LANE, B_GROUP * TRIL_COLS), lambda i: (0, 0)),     # m_tril
                pl.BlockSpec((1, B_GROUP * LOC_COLS), lambda i: (0, 0)),         # b_loc
                pl.BlockSpec((1, B_GROUP * TRIL_COLS), lambda i: (0, 0)),        # b_tril
            ],
            out_specs=(
                pl.BlockSpec((rows_per_step, B_GROUP * LOC_COLS), lambda i: (i, 0)),
                pl.BlockSpec((rows_per_step, B_GROUP * TRIL_COLS), lambda i: (i, 0)),
            ),
        ),
        compiler_params=pltpu.CompilerParams(
            dimension_semantics=("parallel",)),
    )(x_slab, m_loc, m_tril, b_loc, b_tril)

    # Batch-major flat layouts -> module-convention tensors: no-copy reshapes plus a
    # contiguous leading-dim slice (only when B was padded).
    loc = loc_flat.reshape(Bp, LOC_COLS)[:B]
    scale_tril = tril_flat.reshape(Bp, TRIL_COLS)[:B].reshape(B, GAUSS_DIM, GAUSS_DIM)
    return loc, scale_tril


def procoder_reference(x, w, b):
    lc = jnp.dot(x.astype(jnp.float32), w.astype(jnp.float32),
                 precision=jax.lax.Precision.HIGHEST) + b.reshape(1, -1)
    loc = lc[:, :GAUSS_DIM]
    tril = jnp.zeros((x.shape[0], GAUSS_DIM, GAUSS_DIM), jnp.float32)
    tril = tril.at[:, 0, 0].set(jnp.exp(lc[:, GAUSS_DIM]))
    tril = tril.at[:, 1, 1].set(jnp.exp(lc[:, GAUSS_DIM + 1]))
    tril = tril.at[:, 1, 0].set(lc[:, 2 * GAUSS_DIM])
    return loc, tril


if __name__ == "__main__":
    key = jax.random.PRNGKey(0)
    kx, kw, kb = jax.random.split(key, 3)

    # Deterministic synthetic nn.Linear(4, 5) init: U(-1/sqrt(fan_in), 1/sqrt(fan_in))
    bound = 1.0 / (IN_DIM ** 0.5)
    w = jax.random.uniform(kw, (IN_DIM, OUT_DIM), jnp.float32, -bound, bound)
    b = jax.random.uniform(kb, (OUT_DIM,), jnp.float32, -bound, bound)

    # Small batch (single block) and a non-multiple-of-alignment batch (tail padding).
    for B in (16, 300):
        x = jax.random.normal(jax.random.fold_in(kx, B), (B, IN_DIM), jnp.float32)

        loc, scale_tril = procoder_forward(x, w, b)
        jax.block_until_ready((loc, scale_tril))

        ref_loc, ref_tril = procoder_reference(x, w, b)
        assert loc.shape == (B, GAUSS_DIM)
        assert scale_tril.shape == (B, GAUSS_DIM, GAUSS_DIM)
        assert jnp.allclose(loc, ref_loc, atol=1e-5, rtol=1e-4)
        assert jnp.allclose(scale_tril, ref_tril, atol=1e-5, rtol=1e-4)

    print("KERNEL_OK")
</pallas_src>

<mosaic_0001>
module attributes {stable_mosaic.version = 11 : i64} {
  func.func @_procoder_kernel(%arg0: i32, %arg1: memref<8x128xf32, #tpu.memory_space<vmem>>, %arg2: memref<128x64xf32, #tpu.memory_space<vmem>>, %arg3: memref<128x128xf32, #tpu.memory_space<vmem>>, %arg4: memref<1x64xf32, #tpu.memory_space<vmem>>, %arg5: memref<1x128xf32, #tpu.memory_space<vmem>>, %arg6: memref<8x64xf32, #tpu.memory_space<vmem>>, %arg7: memref<8x128xf32, #tpu.memory_space<vmem>>) attributes {dimension_semantics = [#tpu.dimension_semantics<parallel>], iteration_bounds = array<i64: 1>, scalar_prefetch = 0 : i64, scratch_operands = 0 : i64, tpu.core_type = #tpu.core_type<tc>, window_params = [{transform_indices = @transform_0, window_bounds = array<i64: 8, 128>}, {pipeline_mode = #tpu.pipeline_mode<synchronous>, transform_indices = @transform_1, window_bounds = array<i64: 128, 64>}, {pipeline_mode = #tpu.pipeline_mode<synchronous>, transform_indices = @transform_2, window_bounds = array<i64: 128, 128>}, {pipeline_mode = #tpu.pipeline_mode<synchronous>, transform_indices = @transform_3, window_bounds = array<i64: 1, 64>}, {pipeline_mode = #tpu.pipeline_mode<synchronous>, transform_indices = @transform_4, window_bounds = array<i64: 1, 128>}, {transform_indices = @transform_5, window_bounds = array<i64: 8, 64>}, {transform_indices = @transform_6, window_bounds = array<i64: 8, 128>}]} {
    %c0 = arith.constant 0 : index
    %c0_0 = arith.constant 0 : index
    %0 = vector.load %arg1[%c0, %c0_0] : memref<8x128xf32, #tpu.memory_space<vmem>>, vector<8x128xf32>
    %c0_1 = arith.constant 0 : index
    %c0_2 = arith.constant 0 : index
    %1 = vector.load %arg2[%c0_1, %c0_2] : memref<128x64xf32, #tpu.memory_space<vmem>>, vector<128x64xf32>
    %cst = arith.constant dense<0.000000e+00> : vector<8x64xf32>
    %2 = tpu.matmul %0, %1, %cst {dimension_numbers = #tpu.dot_dimension_numbers<[1], [0], [0], [1], [0, 0, 1, 1], [], []>} : vector<8x128xf32>, vector<128x64xf32>, vector<8x64xf32> -> vector<8x64xf32>
    %c0_3 = arith.constant 0 : index
    %c0_4 = arith.constant 0 : index
    %3 = vector.load %arg4[%c0_3, %c0_4] : memref<1x64xf32, #tpu.memory_space<vmem>>, vector<1x64xf32>
    %4 = vector.broadcast %3 : vector<1x64xf32> to vector<8x64xf32>
    %5 = arith.addf %2, %4 : vector<8x64xf32>
    %c0_5 = arith.constant 0 : index
    %c0_6 = arith.constant 0 : index
    %6 = vector.load %arg6[%c0_5, %c0_6] : memref<8x64xf32, #tpu.memory_space<vmem>>, vector<8x64xf32>
    tpu.vector_store %arg6[%c0_5, %c0_6], %5 {strides = array<i32>} : memref<8x64xf32, #tpu.memory_space<vmem>>, vector<8x64xf32>,
    %c0_7 = arith.constant 0 : index
    %c0_8 = arith.constant 0 : index
    %7 = vector.load %arg3[%c0_7, %c0_8] : memref<128x128xf32, #tpu.memory_space<vmem>>, vector<128x128xf32>
    %cst_9 = arith.constant dense<0.000000e+00> : vector<8x128xf32>
    %8 = tpu.matmul %0, %7, %cst_9 {dimension_numbers = #tpu.dot_dimension_numbers<[1], [0], [0], [1], [0, 0, 1, 1], [], []>} : vector<8x128xf32>, vector<128x128xf32>, vector<8x128xf32> -> vector<8x128xf32>
    %c0_10 = arith.constant 0 : index
    %c0_11 = arith.constant 0 : index
    %9 = vector.load %arg5[%c0_10, %c0_11] : memref<1x128xf32, #tpu.memory_space<vmem>>, vector<1x128xf32>
    %10 = vector.broadcast %9 : vector<1x128xf32> to vector<8x128xf32>
    %11 = arith.addf %8, %10 : vector<8x128xf32>
    %12 = tpu.iota {dimensions = array<i32: 1>} : vector<8x128xi32>
    %c3_i32 = arith.constant 3 : i32
    %13 = vector.broadcast %c3_i32 : i32 to vector<8x128xi32>
    %14 = arith.andi %12, %13 : vector<8x128xi32>
    %c0_i32 = arith.constant 0 : i32
    %15 = vector.broadcast %c0_i32 : i32 to vector<8x128xi32>
    %16 = arith.cmpi eq, %14, %15 : vector<8x128xi32>
    %c3_i32_12 = arith.constant 3 : i32
    %17 = vector.broadcast %c3_i32_12 : i32 to vector<8x128xi32>
    %18 = arith.cmpi eq, %14, %17 : vector<8x128xi32>
    %19 = arith.ori %16, %18 : vector<8x128xi1>
    %20 = math.exp %11 : vector<8x128xf32>
    %21 = arith.select %19, %20, %11 : vector<8x128xi1>, vector<8x128xf32>
    %c0_13 = arith.constant 0 : index
    %c0_14 = arith.constant 0 : index
    %22 = vector.load %arg7[%c0_13, %c0_14] : memref<8x128xf32, #tpu.memory_space<vmem>>, vector<8x128xf32>
    tpu.vector_store %arg7[%c0_13, %c0_14], %21 {strides = array<i32>} : memref<8x128xf32, #tpu.memory_space<vmem>>, vector<8x128xf32>,
    return
  }
  func.func @transform_0(%arg0: i32) -> (i32, i32) {
    %c0_i32 = arith.constant 0 : i32
    %c0_i32_0 = arith.constant 0 : i32
    return %arg0, %c0_i32 : i32, i32
  }
  func.func @transform_1(%arg0: i32) -> (i32, i32) {
    %c0_i32 = arith.constant 0 : i32
    %c0_i32_0 = arith.constant 0 : i32
    %c0_i32_1 = arith.constant 0 : i32
    return %c0_i32, %c0_i32_0 : i32, i32
  }
  func.func @transform_2(%arg0: i32) -> (i32, i32) {
    %c0_i32 = arith.constant 0 : i32
    %c0_i32_0 = arith.constant 0 : i32
    %c0_i32_1 = arith.constant 0 : i32
    return %c0_i32, %c0_i32_0 : i32, i32
  }
  func.func @transform_3(%arg0: i32) -> (i32, i32) {
    %c0_i32 = arith.constant 0 : i32
    %c0_i32_0 = arith.constant 0 : i32
    %c0_i32_1 = arith.constant 0 : i32
    return %c0_i32, %c0_i32_0 : i32, i32
  }
  func.func @transform_4(%arg0: i32) -> (i32, i32) {
    %c0_i32 = arith.constant 0 : i32
    %c0_i32_0 = arith.constant 0 : i32
    %c0_i32_1 = arith.constant 0 : i32
    return %c0_i32, %c0_i32_0 : i32, i32
  }
  func.func @transform_5(%arg0: i32) -> (i32, i32) {
    %c0_i32 = arith.constant 0 : i32
    %c0_i32_0 = arith.constant 0 : i32
    return %arg0, %c0_i32 : i32, i32
  }
  func.func @transform_6(%arg0: i32) -> (i32, i32) {
    %c0_i32 = arith.constant 0 : i32
    %c0_i32_0 = arith.constant 0 : i32
    return %arg0, %c0_i32 : i32, i32
  }
}

</mosaic_0001>

<bundles_post_ra>
// kernel: tpu_custom_call.1
= control target key start
LH: loop header
LB: loop body
LE: loop exit
PB: predicated region body
PF: predicated region fallthrough
CT: control target
= control target key end

     0   :  { %12 = vsyncpa [#allocation3], 0  ;;  %v460_v3 = vmov 0.0|0.0   ;;  %vm461_vm0 = vmmov 0   ;;  %v462_v7 = vmov 0.0   ;;  %s645_s0 = inlined_call_operand.vmem [shape: f32[8,128], index: 0, kind: input, shape index: {}]   ;;  %s646_s1 = inlined_call_operand.vmem [shape: f32[128,64], index: 1, kind: input, shape index: {}]   ;;  %s647_s2 = inlined_call_operand.vmem [shape: f32[128,128], index: 2, kind: input, shape index: {}]   ;;  %s648_s3 = inlined_call_operand.vmem [shape: f32[1,64], index: 3, kind: input, shape index: {}]   ;;  %s649_s4 = inlined_call_operand.vmem [shape: f32[1,128], index: 4, kind: input, shape index: {}]   ;;  %s650_s5 = inlined_call_operand.hbm [shape: f32[8,64], index: 5, kind: output, shape index: {0}]   ;;  %s651_s6 = inlined_call_operand.hbm [shape: f32[8,128], index: 6, kind: output, shape index: {1}]  }
   0x1   :  { %v120_v0 = vld [vmem:[%s647_s2] sm:$0xff]  ;;  %v121_v1 = vld [vmem:[%s647_s2 + $0x8] sm:$0xff]  ;;  %v122_v2 = vld [vmem:[%s647_s2 + $0x10] sm:$0xff]  ;;  %381 = vmatprep.subr.bf16.mxu1 %v460_v3  ;;  %357 = vmatprep.subr.bf16.mxu0 %v460_v3 }
   0x2   :  { %v382_v4 = vpack.c.bf16 %v121_v1, %v120_v0  ;;  %v123_v5 = vld [vmem:[%s647_s2 + $0x18] sm:$0xff]  ;;  %v25_v6 = vld [vmem:[%s646_s1] sm:$0xff]  ;;  %354 = vmatprep.mubr.msk.f32.mxu1 %vm461_vm0, %v462_v7  ;;  %319 = vmatprep.mubr.msk.f32.mxu0 %vm461_vm0, %v462_v7  ;;  %v26_v10 = vld [vmem:[%s646_s1 + $0x8] sm:$0xff] }
   0x3   :  { %v385_v8 = vpack.c.bf16 %v123_v5, %v122_v2  ;;  %v124_v9 = vld [vmem:[%s647_s2 + $0x20] sm:$0xff]  ;;  %v125_v11 = vld [vmem:[%s647_s2 + $0x28] sm:$0xff]  ;;  %v358_v12 = vpack.c.bf16 %v26_v10, %v25_v6  ;;  %v27_v13 = vld [vmem:[%s646_s1 + $0x10] sm:$0xff] }
   0x4   :  { %383 = vmatpush3.bf16.msra.mxu1 %v382_v4  ;;  %v28_v14 = vld [vmem:[%s646_s1 + $0x18] sm:$0xff]  ;;  %v388_v16 = vpack.c.bf16 %v125_v11, %v124_v9  ;;  %v29_v17 = vld [vmem:[%s646_s1 + $0x20] sm:$0xff]  ;;  %v30_v18 = vld [vmem:[%s646_s1 + $0x28] sm:$0xff] }
   0x5   :  { %384 = vmatprep.subr.bf16.mxu1 %v460_v3  ;;  %359 = vmatpush3.bf16.msra.mxu0 %v358_v12  ;;  %v361_v15 = vpack.c.bf16 %v28_v14, %v27_v13  ;;  %v126_v19 = vld [vmem:[%s647_s2 + $0x30] sm:$0xff]  ;;  %v127_v20 = vld [vmem:[%s647_s2 + $0x38] sm:$0xff]  ;;  %v364_v21 = vpack.c.bf16 %v30_v18, %v29_v17 }
   0x6   :  { %360 = vmatprep.subr.bf16.mxu0 %v460_v3  ;;  %v391_v22 = vpack.c.bf16 %v127_v20, %v126_v19  ;;  %v31_v23 = vld [vmem:[%s646_s1 + $0x30] sm:$0xff]  ;;  %v32_v24 = vld [vmem:[%s646_s1 + $0x38] sm:$0xff] }
   0x8   :  { %386 = vmatpush3.bf16.msra.mxu1 %v385_v8 }
   0x9   :  { %387 = vmatprep.subr.bf16.mxu1 %v460_v3  ;;  %362 = vmatpush3.bf16.msra.mxu0 %v361_v15 }
   0xa   :  { %363 = vmatprep.subr.bf16.mxu0 %v460_v3 }
   0xc   :  { %389 = vmatpush3.bf16.msra.mxu1 %v388_v16 }
   0xd   :  { %13 = vsyncpa [#allocation5], 0  ;;  %390 = vmatprep.subr.bf16.mxu1 %v460_v3  ;;  %v128_v25 = vld [vmem:[%s647_s2 + $0x40] sm:$0xff]  ;;  %v129_v26 = vld [vmem:[%s647_s2 + $0x48] sm:$0xff]  ;;  %365 = vmatpush3.bf16.msra.mxu0 %v364_v21  ;;  %v367_v27 = vpack.c.bf16 %v32_v24, %v31_v23  ;;  %v213_v52 = vlaneseq  ;;  %s463_s17 = smov [#allocation2]   ;;  %vm118_vm1 = vcmask 523264  }
   0xe   :  { %v394_v28 = vpack.c.bf16 %v129_v26, %v128_v25  ;;  %366 = vmatprep.subr.bf16.mxu0 %v460_v3  ;;  %v33_v29 = vld [vmem:[%s646_s1 + $0x40] sm:$0xff]  ;;  %v34_v30 = vld [vmem:[%s646_s1 + $0x48] sm:$0xff]  ;;  %v130_v31 = vld [vmem:[%s647_s2 + $0x50] sm:$0xff]  ;;  %s229_s18 = sshll.u32 %s463_s17, 4  ;;  %s230_s18 = int_to_ptr.vmem [resolvable:$true] %s229_s18 }
   0xf   :  { %v131_v32 = vld [vmem:[%s647_s2 + $0x58] sm:$0xff]  ;;  %v370_v33 = vpack.c.bf16 %v34_v30, %v33_v29  ;;  %v35_v35 = vld [vmem:[%s646_s1 + $0x50] sm:$0xff]  ;;  %v132_v37 = vld [vmem:[%s647_s2 + $0x60] sm:$0xff]  ;;  %v214_v57 = vand.u32 127, %v213_v52  ;;  %p417_p1 = scmp.lt.s32.totalorder %s230_s18, %s230_s18 }
  0x10   :  { %392 = vmatpush3.bf16.msra.mxu1 %v391_v22  ;;  %v397_v34 = vpack.c.bf16 %v131_v32, %v130_v31  ;;  %v36_v36 = vld [vmem:[%s646_s1 + $0x58] sm:$0xff]  ;;  %v133_v38 = vld [vmem:[%s647_s2 + $0x68] sm:$0xff]  ;;  %v37_v41 = vld [vmem:[%s646_s1 + $0x60] sm:$0xff] }
  0x11   :  { %393 = vmatprep.subr.bf16.mxu1 %v460_v3  ;;  %368 = vmatpush3.bf16.msra.mxu0 %v367_v27  ;;  %v373_v39 = vpack.c.bf16 %v36_v36, %v35_v35  ;;  %v400_v40 = vpack.c.bf16 %v133_v38, %v132_v37  ;;  %v38_v42 = vld [vmem:[%s646_s1 + $0x68] sm:$0xff]  ;;  %v134_v43 = vld [vmem:[%s647_s2 + $0x70] sm:$0xff]  ;;  %v135_v44 = vld [vmem:[%s647_s2 + $0x78] sm:$0xff]  ;;  %v215_v62 = vand.u32 3, %v214_v57 }
  0x12   :  { %369 = vmatprep.subr.bf16.mxu0 %v460_v3  ;;  %v376_v45 = vpack.c.bf16 %v38_v42, %v37_v41  ;;  %v403_v46 = vpack.c.bf16 %v135_v44, %v134_v43  ;;  %v39_v47 = vld [vmem:[%s646_s1 + $0x70] sm:$0xff]  ;;  %v40_v48 = vld [vmem:[%s646_s1 + $0x78] sm:$0xff]  ;;  %v24_v50 = vld [vmem:[%s645_s0] sm:$0xff]  ;;  %s412_s0 = scalar_lea.vmem %s230_s18, 128 }
  0x13   :  { %v379_v49 = vpack.c.bf16 %v40_v48, %v39_v47  ;;  %v252_v51 = vld [vmem:[%s649_s4] ss:$0 sm:$0xff]  ;;  %p413_p0 = scmp.ne.s32.totalorder %s230_s18, %s412_s0  ;;  %p418_p2 = scmp.lt.s32.totalorder %s412_s0, %s412_s0 }
  0x14   :  { %395 = vmatpush3.bf16.msra.mxu1 %v394_v28  ;;  %v251_v56 = vld [vmem:[%s648_s3] ss:$0 sm:$0xff] }
  0x15   :  { %396 = vmatprep.subr.bf16.mxu1 %v460_v3  ;;  %371 = vmatpush3.bf16.msra.mxu0 %v370_v33  ;;  %p419_p3 = por %p418_p2, %p417_p1 }
  0x16   :  { %372 = vmatprep.subr.bf16.mxu0 %v460_v3 }
  0x17   :  { %p420_p4 = pnand %p419_p3, %p413_p0 }
  0x18   :  { %398 = vmatpush3.bf16.msra.mxu1 %v397_v34 }
  0x19   :  { %399 = vmatprep.subr.bf16.mxu1 %v460_v3  ;;  %374 = vmatpush3.bf16.msra.mxu0 %v373_v39 }
  0x1a   :  { %375 = vmatprep.subr.bf16.mxu0 %v460_v3 }
  0x1c   :  { %401 = vmatpush3.bf16.msra.mxu1 %v400_v40 }
  0x1d   :  { %402 = vmatprep.subr.bf16.mxu1 %v460_v3  ;;  %377 = vmatpush3.bf16.msra.mxu0 %v376_v45 }
  0x1e   :  { %378 = vmatprep.subr.bf16.mxu0 %v460_v3 }
  0x20   :  { %404 = vmatpush3.bf16.msra.mxu1 %v403_v46 }
  0x21   :  { %380 = vmatpush3.bf16.msra.mxu0 %v379_v49 }
  0x23   :  { %355 = vmatmul.mubr.f32.vlgmr.msra.gmra.mrb[0].mxu1 %v24_v50 }
  0x24   :  { %320 = vmatmul.mubr.f32.vlgmr.msra.gmra.mrb[0].mxu0 %v24_v50 }
  0xf6   :  { %v209_v53 = vpop.f32.mrb[0].mxu1 }
  0xf7   :  { %v210_v54 = vadd.f32 %v252_v51, %v209_v53  ;;  %v356_v55 = vpop.f32.mrb[1].mxu1  ;;  %v114_v59 = vpop.f32.mrb[0].mxu0 }
  0xf8   :  { %v115_v60 = vadd.f32 %v251_v56, %v114_v59  ;;  %v321_v61 = vpop.f32.mrb[1].mxu0 }
  0xf9   :  { %v219_v58 = vmul.f32 1.442695, %v210_v54 }
  0xfa   :  { %119 = vst.msk [vmem:[#allocation2] sm:$0xff] %vm118_vm1, %v115_v60 }
  0xfb   :  { %410 = vpow2.f32 %v219_v58 }
  0xfc   :  { %423 = shalt.err (!%p420_p4)
}
  0xfd   :  { %s424_s19 = scalar_lea.hbm %s650_s5, 128 }
  0xfe   :  { %p425_p5 = scmp.ne.s32.totalorder %s650_s5, %s424_s19  ;;  %p428_p6 = scmp.lt.u32.totalorder %s424_s19, %s650_s5 }
 0x100   :  { %p430_p7 = pnand %p428_p6, %p425_p5 }
 0x102   :  { %433 = shalt.err (!%p430_p7)
}
 0x103   :  { %232 = dma.vmem_to_hbm [thread:$0]  %s230_s18, 128, %s650_s5, [#allocation3]   ;;  %vm216_vm2 = vcmp.eq.s32.totalorder %v215_v62, 0  ;;  %vm217_vm3 = vcmp.eq.s32.totalorder %v215_v62, 3 }
 0x104   :  { %s464_s26 = smov [#allocation4]   ;;  %vm218_vm4 = vmor %vm216_vm2, %vm217_vm3 }
 0x105   :  { %s239_s27 = sshll.u32 %s464_s26, 4  ;;  %v411_v63 = vpop.eup %410  ;;  %s240_s27 = int_to_ptr.vmem [resolvable:$true] %s239_s27 }
 0x106   :  { %v221_v0 = vsel %vm218_vm4, %v411_v63, %v210_v54  ;;  %s434_s28 = scalar_lea.vmem %s240_s27, 128  ;;  %p439_p9 = scmp.lt.s32.totalorder %s240_s27, %s240_s27 }
 0x107   :  { %222 = vst [vmem:[#allocation4] sm:$0xff] %v221_v0  ;;  %p435_p8 = scmp.ne.s32.totalorder %s240_s27, %s434_s28  ;;  %p440_p10 = scmp.lt.s32.totalorder %s434_s28, %s434_s28 }
 0x109   :  { %p441_p11 = por %p440_p10, %p439_p9 }
 0x10b   :  { %p442_p12 = pnand %p441_p11, %p435_p8 }
 0x10d   :  { %445 = shalt.err (!%p442_p12)
}
 0x10e   :  { %s446_s5 = scalar_lea.hbm %s651_s6, 128 }
 0x10f   :  { %p447_p13 = scmp.ne.s32.totalorder %s651_s6, %s446_s5  ;;  %p450_p0 = scmp.lt.u32.totalorder %s446_s5, %s651_s6 }
 0x111   :  { %p452_p1 = pnand %p450_p0, %p447_p13 }
 0x113   :  { %455 = shalt.err (!%p452_p1)
}
 0x114   :  { %242 = dma.vmem_to_hbm [thread:$0]  %s240_s27, 128, %s651_s6, [#allocation5]  }
 0x115   :  { %456 = dma.done.wait [#allocation3], 128  }
 0x116   :  { %457 = vsyncadd [#allocation3], 4294967168 }
 0x117   :  { %458 = dma.done.wait [#allocation5], 128  }
 0x118   :  { %459 = vsyncadd [#allocation5], 4294967168 }
 0x119   :  { %249 = vsyncpa [#allocation3], 1 }
 0x11a   :  { %250 = vsyncpa [#allocation5], 1 }

</bundles_post_ra>
